<compile_context>
chip_gen: v5e
topology: v5e:2x2
jax: 0.10.0
libtpu: 0.0.40
codegen_flags: <defaults>
</compile_context>

<pallas_src>
import jax
import jax.numpy as jnp
from jax.experimental import pallas as pl
from jax.experimental.pallas import tpu as pltpu


def _round_up(x, m):
    return ((x + m - 1) // m) * m


def _pick_tm(n_rows, tm_max=512):
    """Row tile: multiple of 8, tries to expose >= 2 'parallel' grid steps (v7x megacore),
    capped at 512 rows (per-step VMEM ~1 MiB even at KCpad=256, well under every limit)."""
    tm = _round_up(max((n_rows + 1) // 2, 8), 8)
    return min(tm, tm_max)


def _subm_matmul_kernel(x_ref, w_ref, o_ref):
    """One tile of active rows per grid step.

    x_ref: [TM, KCpad]   bf16 sparse-im2col rows (lane-dense; padding via sentinel taps)
    w_ref: [KCpad, COpad] bf16 weight matrix (resident across grid steps)
    o_ref: [TM, COpad]   bf16/f32 output (lane-dense -> unmasked full-width stores)
    """
    o_ref[...] = jnp.dot(
        x_ref[...], w_ref[...], preferred_element_type=jnp.float32
    ).astype(o_ref.dtype)


def subm_conv3d_layer(feat_table, nbr, sentinel, w_mat_padded, *, out_dtype, tm):
    """One submanifold conv layer over active sites only (rule-table formulation).

    feat_table:   [Npad, Cin] bf16; row `sentinel` and every row >= N_active are zero.
    nbr:          [Npad, K^3] int32 neighbor row indices (sentinel = missing neighbor).
    w_mat_padded: [KCpad, COpad] bf16, zero-padded; KCpad, COpad multiples of 128.
    returns:      [Npad, COpad] out_dtype (padding rows / channels stay exactly zero).
    """
    n_pad, cin = feat_table.shape
    ntaps = nbr.shape[1]
    kc = ntaps * cin
    kc_pad, co_pad = w_mat_padded.shape
    assert n_pad % tm == 0

    if kc_pad % cin == 0:
        # Pad the contraction dim by appending sentinel taps to the tiny int32 rule table:
        # the gather itself produces the lane-dense [Npad, KCpad] operand (no extra bf16 pad
        # copy of the activation stream).
        nbr = jnp.pad(nbr, ((0, 0), (0, kc_pad // cin - ntaps)),
                      constant_values=sentinel)
        xcol = feat_table[nbr.reshape(-1), :].reshape(n_pad, kc_pad)
    else:
        xcol = feat_table[nbr.reshape(-1), :].reshape(n_pad, kc)
        xcol = jnp.pad(xcol, ((0, 0), (0, kc_pad - kc)))

    grid = (n_pad // tm,)
    return pl.pallas_call(
        _subm_matmul_kernel,
        out_shape=jax.ShapeDtypeStruct((n_pad, co_pad), out_dtype),
        grid_spec=pltpu.PrefetchScalarGridSpec(
            num_scalar_prefetch=0,
            grid=grid,
            in_specs=[
                pl.BlockSpec((tm, kc_pad), lambda i: (i, 0)),
                pl.BlockSpec((kc_pad, co_pad), lambda i: (0, 0)),
            ],
            out_specs=pl.BlockSpec((tm, co_pad), lambda i: (i, 0)),
        ),
        compiler_params=pltpu.CompilerParams(
            dimension_semantics=("parallel",),
            # explicit override is load-bearing on v5e (16 MiB default scoped VMEM)
            vmem_limit_bytes=32 * 1024 * 1024,
        ),
    )(xcol, w_mat_padded)


class SubmanifoldConvTest:
    """JAX/Pallas port of SubmanifoldConvTestTorch (stack of SubMConv3d, bias=False)."""

    def __init__(self, num_layers, ndim, shape, in_channels, out_channels,
                 kernel_size, stride, key):
        assert ndim == 3, "only 3D submanifold conv implemented"
        assert stride == 1, "SubMConv3d is a submanifold conv: stride is effectively 1"
        assert kernel_size % 2 == 1, "submanifold conv requires odd kernel size"
        self.shape = tuple(shape)
        self.kernel_size = kernel_size
        K = kernel_size
        cin = in_channels
        self.layer_params = []  # (w_mat_padded bf16 [KCpad, COpad], cin, cout)
        for _ in range(num_layers):
            key, sub = jax.random.split(key)
            fan_in = cin * K ** 3
            w = jax.random.normal(
                sub, (K, K, K, cin, out_channels), dtype=jnp.float32
            ) * (1.0 / jnp.sqrt(fan_in))
            kc = K ** 3 * cin
            kc_pad = _round_up(kc, 128)
            co_pad = _round_up(out_channels, 128)
            # fold taps into the contraction dim once at init; order (kd, kh, kw, cin)
            w_mat = jnp.pad(w.reshape(kc, out_channels),
                            ((0, kc_pad - kc), (0, co_pad - out_channels)))
            self.layer_params.append((w_mat.astype(jnp.bfloat16), cin, out_channels))
            cin = out_channels

    def __call__(self, features, coors, batch_size, *, tm=None):
        # coors: [N, 4] = (batch, z, y, x); features: [N, Cin]
        # (duplicate coordinates are assumed absent, matching the unique-coordinate test)
        coors = coors.astype(jnp.int32)
        D, H, W = self.shape
        K = self.kernel_size
        p = K // 2
        N = features.shape[0]
        if tm is None:
            tm = _pick_tm(N + 1)
        n_pad = _round_up(N + 1, tm)     # >= N+1 so row N is a guaranteed-zero sentinel row
        sentinel = N

        b, z, y, x = coors[:, 0], coors[:, 1], coors[:, 2], coors[:, 3]

        # ---- rule table (built once; active set is identical for every subm layer) ----
        # dense int32 index volume; sentinel marks inactive / out-of-bounds voxels
        idx_vol = jnp.full((batch_size, D + 2 * p, H + 2 * p, W + 2 * p),
                           sentinel, jnp.int32)
        idx_vol = idx_vol.at[b, z + p, y + p, x + p].set(jnp.arange(N, dtype=jnp.int32))
        # tap order (kd, kh, kw) matches the weight reshape order (kd, kh, kw, cin)
        nbr_cols = [idx_vol[b, z + kd, y + kh, x + kw]
                    for kd in range(K) for kh in range(K) for kw in range(K)]
        nbr = jnp.stack(nbr_cols, axis=1)                                   # [N, K^3]
        nbr = jnp.pad(nbr, ((0, n_pad - N), (0, 0)), constant_values=sentinel)

        # ---- bf16 feature table; rows >= N (incl. sentinel row N) are exactly zero ----
        feat = jnp.zeros((n_pad, features.shape[1]), jnp.bfloat16)
        feat = feat.at[:N].set(features.astype(jnp.bfloat16))

        out = None
        cout = None
        n_layers = len(self.layer_params)
        for li, (w_mat, cin, cout) in enumerate(self.layer_params):
            is_last = li == n_layers - 1
            out = subm_conv3d_layer(
                feat, nbr, sentinel, w_mat,
                out_dtype=jnp.float32 if is_last else jnp.bfloat16, tm=tm)
            if not is_last:
                # stay in the padded lane-dense sparse layout; only narrow to the real
                # channel count for the next layer's row-wise gather (zero rows preserved)
                feat = out[:, :cout]

        out_features = out[:N, :cout]
        return out_features, coors


def _reference_dense(features, coors, batch_size, model, shape, K):
    """Pure-JAX dense f32 reference of the submanifold conv stack (validation only)."""
    D, H, W = shape
    b, z, y, x = coors[:, 0], coors[:, 1], coors[:, 2], coors[:, 3]
    cin0 = features.shape[1]
    feats_bf = features.astype(jnp.bfloat16).astype(jnp.float32)
    dense = jnp.zeros((batch_size, D, H, W, cin0), jnp.float32).at[b, z, y, x].set(feats_bf)
    mask = jnp.zeros((batch_size, D, H, W, 1), jnp.float32).at[b, z, y, x].set(1.0)
    p = K // 2
    for (w_mat, cin, cout) in model.layer_params:
        w = w_mat[:K ** 3 * cin, :cout].astype(jnp.float32).reshape(K, K, K, cin, cout)
        xp = jnp.pad(dense, ((0, 0), (p, p), (p, p), (p, p), (0, 0)))
        acc = jnp.zeros((batch_size, D, H, W, cout), jnp.float32)
        for kd in range(K):
            for kh in range(K):
                for kw in range(K):
                    acc = acc + jnp.einsum(
                        "bdhwc,co->bdhwo",
                        xp[:, kd:kd + D, kh:kh + H, kw:kw + W, :], w[kd, kh, kw])
        dense = acc * mask   # submanifold: outputs only at active sites
    return dense[b, z, y, x]


if __name__ == "__main__":
    # Small shapes consistent with the module's forward.
    batch_size = 2
    shape = (8, 8, 8)            # spatial D, H, W
    in_channels = 4
    out_channels = 8
    kernel_size = 3
    num_layers = 2
    n_per_batch = 32

    key = jax.random.PRNGKey(0)
    k_model, k_feat, k_coor = jax.random.split(key, 3)

    model = SubmanifoldConvTest(num_layers, 3, shape, in_channels, out_channels,
                                kernel_size, 1, k_model)

    # Deterministic unique active coordinates per batch element.
    D, H, W = shape
    coors_list = []
    for bi in range(batch_size):
        kb = jax.random.fold_in(k_coor, bi)
        flat = jax.random.permutation(kb, D * H * W)[:n_per_batch]
        z = (flat // (H * W)).astype(jnp.int32)
        y = ((flat // W) % H).astype(jnp.int32)
        x = (flat % W).astype(jnp.int32)
        bcol = jnp.full((n_per_batch,), bi, dtype=jnp.int32)
        coors_list.append(jnp.stack([bcol, z, y, x], axis=1))
    coors = jnp.concatenate(coors_list, axis=0)                 # [64, 4]
    features = jax.random.normal(k_feat, (coors.shape[0], in_channels),
                                 dtype=jnp.float32)             # [64, 4]

    out_features, out_coors = model(features, coors, batch_size)
    jax.block_until_ready(out_features)
    assert out_features.shape == (coors.shape[0], out_channels)
    assert out_coors.shape == coors.shape
    assert bool(jnp.all(jnp.isfinite(out_features)))

    # Numerical check vs a dense f32 reference (bf16 operands / intermediates -> loose tol).
    ref = _reference_dense(features, coors, batch_size, model, shape, kernel_size)
    max_err = float(jnp.max(jnp.abs(out_features - ref)))
    assert max_err < 1e-1, f"max abs error vs dense reference: {max_err}"

    print("KERNEL_OK")
</pallas_src>

<mosaic_0001>
module attributes {stable_mosaic.version = 11 : i64} {
  func.func @_subm_matmul_kernel(%arg0: i32, %arg1: memref<40x128xbf16, #tpu.memory_space<vmem>>, %arg2: memref<128x128xbf16, #tpu.memory_space<vmem>>, %arg3: memref<40x128xbf16, #tpu.memory_space<vmem>>) attributes {dimension_semantics = [#tpu.dimension_semantics<parallel>], iteration_bounds = array<i64: 2>, scalar_prefetch = 0 : i64, scratch_operands = 0 : i64, tpu.core_type = #tpu.core_type<tc>, window_params = [{transform_indices = @transform_0, window_bounds = array<i64: 40, 128>}, {pipeline_mode = #tpu.pipeline_mode<synchronous>, transform_indices = @transform_1, window_bounds = array<i64: 128, 128>}, {transform_indices = @transform_2, window_bounds = array<i64: 40, 128>}]} {
    %c0 = arith.constant 0 : index
    %c0_0 = arith.constant 0 : index
    %0 = vector.load %arg1[%c0, %c0_0] : memref<40x128xbf16, #tpu.memory_space<vmem>>, vector<40x128xbf16>
    %c0_1 = arith.constant 0 : index
    %c0_2 = arith.constant 0 : index
    %1 = vector.load %arg2[%c0_1, %c0_2] : memref<128x128xbf16, #tpu.memory_space<vmem>>, vector<128x128xbf16>
    %cst = arith.constant dense<0.000000e+00> : vector<40x128xf32>
    %2 = tpu.matmul %0, %1, %cst {dimension_numbers = #tpu.dot_dimension_numbers<[1], [0], [0], [1], [0, 0, 1, 1], [], []>} : vector<40x128xbf16>, vector<128x128xbf16>, vector<40x128xf32> -> vector<40x128xf32>
    %3 = arith.truncf %2 : vector<40x128xf32> to vector<40x128xbf16>
    %c0_3 = arith.constant 0 : index
    %c0_4 = arith.constant 0 : index
    %4 = vector.load %arg3[%c0_3, %c0_4] : memref<40x128xbf16, #tpu.memory_space<vmem>>, vector<40x128xbf16>
    tpu.vector_store %arg3[%c0_3, %c0_4], %3 {strides = array<i32>} : memref<40x128xbf16, #tpu.memory_space<vmem>>, vector<40x128xbf16>,
    return
  }
  func.func @transform_0(%arg0: i32) -> (i32, i32) {
    %c0_i32 = arith.constant 0 : i32
    %c0_i32_0 = arith.constant 0 : i32
    return %arg0, %c0_i32 : i32, i32
  }
  func.func @transform_1(%arg0: i32) -> (i32, i32) {
    %c0_i32 = arith.constant 0 : i32
    %c0_i32_0 = arith.constant 0 : i32
    %c0_i32_1 = arith.constant 0 : i32
    return %c0_i32, %c0_i32_0 : i32, i32
  }
  func.func @transform_2(%arg0: i32) -> (i32, i32) {
    %c0_i32 = arith.constant 0 : i32
    %c0_i32_0 = arith.constant 0 : i32
    return %arg0, %c0_i32 : i32, i32
  }
}

</mosaic_0001>

<bundles_post_ra>
// kernel: tpu_custom_call.1
= control target key start
LH: loop header
LB: loop body
LE: loop exit
PB: predicated region body
PF: predicated region fallthrough
CT: control target
= control target key end

     0   :  { %7 = vsyncpa [#allocation3], 0  ;;  %s857_s0 = inlined_call_operand.hbm [shape: bf16[80,128], index: 0, kind: input, shape index: {}]   ;;  %s858_s1 = inlined_call_operand.hbm [shape: bf16[128,128], index: 1, kind: input, shape index: {}]   ;;  %s859_s2 = inlined_call_operand.hbm [shape: bf16[80,128], index: 2, kind: output, shape index: {}]  }
   0x1   :  { %9 = vsyncpa [#allocation3 + $0x1], 0 }
   0x2   :  { %10 = vsyncpa [#allocation6], 0 }
   0x3   :  { %11 = vsyncpa [#allocation4], 0 }
   0x4   :  { %13 = vsyncpa [#allocation4 + $0x1], 0  ;;  %s704_s9 = smov 0   ;;  %s706_s10 = smov 0  }
   0x5   :  { %s708_s11 = smov 0   ;;  %s710_s12 = smov 0  }
   0x6 LB: > { %s725_s13 = sadd.s32 4294967295, %s682_s12   ;;  %s400_s14 = sadd.s32 4294967294, %s682_s12   ;;  %s682_s12 = sphi %s710_s12, %s869_s12   ;;  %s678_s11 = sphi %s708_s11, %s868_s11   ;;  %s674_s10 = sphi %s706_s10, %s867_s10   ;;  %s670_s9 = sphi %s704_s9, %s866_s9  }
   0x7   : > { %p39_p0 = scmp.ne.s32.totalorder %s674_s10, %s670_s9  ;;  %p40_p1 = scmp.eq.s32.totalorder %s725_s13, 0 }
   0x8   : > { %p84_p2 = scmp.eq.s32.totalorder %s725_s13, 1  ;;  %p90_p3 = scmp.eq.s32.totalorder %s400_s14, 1 }
   0x9   : > { %p734_p4 = por %p40_p1, %p39_p0  ;;  %p401_p5 = scmp.ge.s32.totalorder %s682_s12, 1 }
   0xa   : > { %p739_p6 = por %p90_p3, %p39_p0  ;;  %p97_p7 = scmp.lt.s32.totalorder %s682_s12, 3 }
   0xb   : > { %s108_s19 = sshll.u32 %s858_s1, 4  ;;  %s684_s21 = smov [#allocation5]   ;;  %s109_s19 = int_to_ptr.hbm [resolvable:$true] %s108_s19 }
   0xc   : > { %p747_p8 = pnand %p401_p5, %p97_p7  ;;  %s110_s22 = sshll.u32 %s684_s21, 4  ;;  %s111_s22 = int_to_ptr.vmem [resolvable:$true] %s110_s22 }
   0xd   : > { %s757_s23 = sadd.s32 1, %s682_s12   ;;  %s685_s24 = smov 64  }
   0xe   : > { %p499_p9 = pneg %p747_p8  ;;  %s686_s25 = smov 4  }
   0xf   : > { %s23_s26 = ssub.s32 %s682_s12, %s757_s23  ;;  %s26_s27 = sadd.s32 1, %s678_s11 }
  0x10   : > { %p500_p10 = pnand %p499_p9, %p40_p1  ;;  %p24_p12 = scmp.eq.s32.totalorder %s23_s26, 0 }
  0x11   : > { %p33_p13 = scmp.ne.s32.totalorder %s678_s11, %s674_s10  ;;  %p34_p0 = scmp.eq.s32.totalorder %s682_s12, 0 }
  0x12   : > { %502 = dma.hbm_to_vmem [thread:$0]  (!%p500_p10), %s109_s19, 1024, %s111_s22, [#allocation6], %s685_s24, %s685_s24, %s686_s25  }
  0x13   : > { %p512_p3 = scmp.lt.s32.totalorder %s682_s12, 2  ;;  %p35_p5 = por %p34_p0, %p33_p13 }
  0x14   : > { %s770_s28 = scalar_select %p24_p12, %s678_s11, %s26_s27  }
  0x15   : > { %p774_p7 = por %p84_p2, %p33_p13  ;;  %s124_s30 = sand.u32 1, %s678_s11  }
  0x16   : > { %s450_s3 = smul.u32 20, %s682_s12  ;;  %p783_p9 = pnand %p512_p3, %p35_p5 }
  0x17   : > { %s489_s4 = smul.u32 20, %s124_s30  ;;  %s125_s19 = scalar_lea.sflag [#allocation3], %s124_s30 }
  0x18   : > { %s133_s7 = scalar_lea.hbm %s857_s0, %s450_s3  ;;  %p586_p10 = pneg %p783_p9 }
  0x19   : > { %s134_s14 = sshll.u32 %s133_s7, 4  ;;  %s128_s17 = scalar_lea.vmem [#allocation2], %s489_s4  ;;  %s135_s14 = int_to_ptr.hbm [resolvable:$true] %s134_s14 }
  0x1a   : > { %s136_s18 = sshll.u32 %s128_s17, 4  ;;  %s582_s21 = sshra.s32 %s135_s14, 4  ;;  %s137_s18 = int_to_ptr.vmem [resolvable:$true] %s136_s18  ;;  %s583_s21 = int_to_ptr.hbm [resolvable:$true] %s582_s21 }
  0x1b   : > { %s584_s22 = scalar_lea.hbm %s583_s21, 20  ;;  %s589_s3 = scalar_lea.hbm %s857_s0, 40 }
  0x1c   : > { %p585_p2 = scmp.ne.s32.totalorder %s583_s21, %s584_s22  ;;  %p590_p0 = scmp.lt.s32.totalorder %s583_s21, %s857_s0 }
  0x1d   : > { %p591_p3 = scmp.lt.s32.totalorder %s589_s3, %s584_s22 }
  0x1e   : > { %p587_p12 = pnand %p586_p10, %p585_p2 }
  0x1f   : > { %p592_p5 = por %p591_p3, %p590_p0 }
  0x20   : > { %p588_p13 = pneg %p587_p12 }
  0x22   : > { %p593_p11 = pnand %p592_p5, %p588_p13 }
  0x24   : > { %596 = shalt.err (!%p593_p11)
}
  0x25   : > { %506 = dma.hbm_to_vmem [thread:$0]  (!%p783_p9), %s135_s14, 320, %s137_s18, %s125_s19, %s685_s24, %s685_s24, %s686_s25  }
  0x26   : > { %148 = sbr.rel (%p747_p8) target bundleno = 219 (0xdb), region = 28  ;;  %s803_s30 = sand.u32 (!%p747_p8), 1, %s674_s10  }
  0x27   : > { %s490_s4 = smul.u32 (!%p747_p8), 20, %s803_s30  ;;  %s151_s7 = scalar_lea.sflag (!%p747_p8), [#allocation3], %s803_s30 }
  0x29   : > { %s809_s17 = scalar_lea.vmem (!%p747_p8), [#allocation2], %s490_s4 }
  0x2b   : > { %657 = dma.done.wait (%p734_p4), %s151_s7, 320  }
  0x2c   : > { %659 = vsyncadd (%p734_p4), %s151_s7, 4294966976 }
  0x2d   : > { %661 = dma.done.wait (%p40_p1), [#allocation6], 1024  }
  0x2e   : > { %663 = vsyncadd (%p40_p1), [#allocation6], 4294966272  ;;  %v460_v0 = vld [vmem:[#allocation5 + $0x38] sm:$0xff]  ;;  %v459_v1 = vld [vmem:[#allocation5 + $0x30] sm:$0xff]  ;;  %s461_s15 = smul.u32 20, %s725_s13  ;;  %s180_s8 = scalar_lea.vmem [#allocation7], %s490_s4 }
  0x2f   : > { %268 = vmatpush.bf16.msra.mxu0 %v460_v0  ;;  %473 = vmatpush.bf16.msra.mxu1 %v460_v0  ;;  %v458_v2 = vld [vmem:[#allocation5 + $0x28] sm:$0xff]  ;;  %v457_v3 = vld [vmem:[#allocation5 + $0x20] sm:$0xff]  ;;  %v456_v4 = vld [vmem:[#allocation5 + $0x18] sm:$0xff]  ;;  %s314_s14 = sshll.u32 %s180_s8, 4  ;;  %s302_s13 = scalar_lea.sflag [#allocation4], %s803_s30  ;;  %s315_s14 = int_to_ptr.vmem [resolvable:$true] %s314_s14 }
  0x30   : > { %474 = vmatpush.bf16.msra.mxu2 %v460_v0  ;;  %v455_v5 = vld [vmem:[#allocation5 + $0x10] sm:$0xff]  ;;  %v454_v6 = vld [vmem:[#allocation5 + $0x8] sm:$0xff]  ;;  %v453_v8 = vld [vmem:[#allocation5] sm:$0xff]  ;;  %s313_s25 = scalar_lea.hbm %s859_s2, %s461_s15  ;;  %s632_s27 = scalar_lea.hbm %s859_s2, 40 }
  0x31   : > { %v187_v7 = vld [vmem:[%s809_s17 + $0x10] sm:$0xf]  ;;  %v451_v10 = vld [vmem:[%s809_s17] sm:$0xff]  ;;  %v452_v11 = vld [vmem:[%s809_s17 + $0x8] sm:$0xff]  ;;  %s316_s18 = sshll.u32 %s313_s25, 4  ;;  %s317_s18 = int_to_ptr.hbm [resolvable:$true] %s316_s18 }
  0x32   : > { %v213_v9 = vunpack.c.l.b16 %v187_v7  ;;  %s626_s19 = sshra.s32 %s317_s18, 4  ;;  %s627_s19 = int_to_ptr.hbm [resolvable:$true] %s626_s19 }
  0x33   : > { %269 = vmatpush.bf16.msra.mxu0 %v459_v1  ;;  %475 = vmatpush.bf16.msra.mxu1 %v459_v1  ;;  %s628_s21 = scalar_lea.hbm %s627_s19, 20  ;;  %p633_p11 = scmp.lt.s32.totalorder %s627_s19, %s859_s2 }
  0x34   : > { %476 = vmatpush.bf16.msra.mxu2 %v459_v1  ;;  %v216_v12 = vpack.c.b16 %v213_v9, %v213_v9  ;;  %p629_p1 = scmp.ne.s32.totalorder %s627_s19, %s628_s21  ;;  %p634_p9 = scmp.lt.s32.totalorder %s632_s27, %s628_s21 }
  0x36   : > { %p630_p4 = pnand %p629_p1, %p774_p7  ;;  %p635_p2 = por %p634_p9, %p633_p11 }
  0x37   : > { %270 = vmatpush.bf16.msra.mxu0 %v458_v2  ;;  %477 = vmatpush.bf16.msra.mxu1 %v458_v2 }
  0x38   : > { %478 = vmatpush.bf16.msra.mxu2 %v458_v2  ;;  %p631_p8 = pneg %p630_p4 }
  0x3a   : > { %p636_p10 = pnand %p635_p2, %p631_p8 }
  0x3b   : > { %271 = vmatpush.bf16.msra.mxu0 %v457_v3  ;;  %479 = vmatpush.bf16.msra.mxu1 %v457_v3 }
  0x3c   : > { %480 = vmatpush.bf16.msra.mxu2 %v457_v3 }
  0x3f   : > { %272 = vmatpush.bf16.msra.mxu0 %v456_v4  ;;  %481 = vmatpush.bf16.msra.mxu1 %v456_v4 }
  0x40   : > { %482 = vmatpush.bf16.msra.mxu2 %v456_v4 }
  0x43   : > { %273 = vmatpush.bf16.msra.mxu0 %v455_v5  ;;  %483 = vmatpush.bf16.msra.mxu1 %v455_v5 }
  0x44   : > { %484 = vmatpush.bf16.msra.mxu2 %v455_v5 }
  0x47   : > { %274 = vmatpush.bf16.msra.mxu0 %v454_v6  ;;  %485 = vmatpush.bf16.msra.mxu1 %v454_v6 }
  0x48   : > { %486 = vmatpush.bf16.msra.mxu2 %v454_v6 }
  0x4b   : > { %275 = vmatpush.bf16.msra.mxu0 %v453_v8  ;;  %487 = vmatpush.bf16.msra.mxu1 %v453_v8 }
  0x4c   : > { %488 = vmatpush.bf16.msra.mxu2 %v453_v8 }
  0x4e   : > { %276 = vmatmul.bf16.vlgmr.msra.gmra.mxu0 %v451_v10  ;;  %281 = vmatmul.bf16.vlgmr.msra.gmra.mxu1 %v452_v11 }
  0x4f   : > { %286 = vmatmul.bf16.vlgmr.msra.gmra.mxu2 %v216_v12 }
  0xcb   : > { %v277_v13 = vpop.f32.mrf.mxu0  ;;  %v282_v14 = vpop.f32.mrf.mxu1 }
  0xd2   : > { %v287_v15 = vpop.f32.mrf.mxu2 }
  0xd3   : > { %v295_v16 = vpack.c.bf16 %v287_v15, %v287_v15  ;;  %v279_v17 = vpop.f32.mrf.mxu0  ;;  %v284_v18 = vpop.f32.mrf.mxu1 }
  0xd4   : > { %v465_v19 = vpack.c.bf16 %v279_v17, %v277_v13  ;;  %v470_v20 = vpack.c.bf16 %v284_v18, %v282_v14 }
  0xd5   : > { %300 = vst [vmem:[%s180_s8 + $0x10] sm:$0xf] %v295_v16 }
  0xd6   : > { %466 = vst [vmem:[%s180_s8] sm:$0xff] %v465_v19  }
  0xd7   : > { %472 = vst [vmem:[%s180_s8 + $0x8] sm:$0xff] %v470_v20  }
  0xd8   : > { %639 = shalt.err (!%p636_p10)
}
  0xd9   : > { %s687_s6 = smov 64   ;;  %s688_s30 = smov 4  }
  0xda   : > { %497 = dma.vmem_to_hbm [thread:$0]  (%p774_p7), %s315_s14, 320, %s317_s18, %s302_s13, %s687_s6, %s687_s6, %s688_s30   ;;  %v289_v21 = vpop.f32.mrf.mxu2 }
  0xdb PF: > { %s331_s4 = sand.u32 1, %s670_s9   ;;  %p865_p12 = scmp.ge.s32.totalorder %s682_s12, 2 }
  0xdc   : > { %s332_s7 = scalar_lea.sflag [#allocation4], %s331_s4 }
  0xdd   : > { %p508_p13 = pnand %p865_p12, %p739_p6 }
  0xdf   : > { %p509_p0 = pneg %p508_p13 }
  0xe1   : > { %665 = dma.done.wait (%p509_p0), %s332_s7, 320  }
  0xe2   : > { %667 = vsyncadd (%p509_p0), %s332_s7, 4294966976  ;;  %p16_p3 = scmp.ge.s32.totalorder %s757_s23, 4   ;;  %s866_s9 = smov %s674_s10 }
  0xe3   : > { %s867_s10 = smov %s678_s11  ;;  %s868_s11 = smov %s770_s28 }
  0xe4   : > { %s869_s12 = smov %s757_s23  ;;  %18 = sbr.rel (!%p16_p3) target bundleno = 6 (0x6), region = 77 }
  0xe9   :  { %338 = vsyncpa [#allocation3], 1 }
  0xea   :  { %340 = vsyncpa [#allocation3 + $0x1], 1 }
  0xeb   :  { %341 = vsyncpa [#allocation6], 1 }
  0xec   :  { %342 = vsyncpa [#allocation4], 1 }
  0xed   :  { %344 = vsyncpa [#allocation4 + $0x1], 1 }

</bundles_post_ra>
